<compile_context>
chip_gen: v7x
topology: tpu7x:2x2x1
jax: 0.10.0
libtpu: 0.0.40
codegen_flags: <defaults>
</compile_context>

<pallas_src>
import functools

import jax
import jax.numpy as jnp
from jax.experimental import pallas as pl
from jax.experimental.pallas import tpu as pltpu


def _round_up(n, m):
    return (n + m - 1) // m * m


def _mlp_kernel(x_ref, w1_ref, b1_ref, w2_ref, b2_ref, o_ref):
    # x_ref:  (TB, Dp)  bf16 batch tile (pipelined over the grid)
    # w1_ref: (Dp, H)   bf16, VMEM-resident across the grid
    # b1_ref: (1, H)    f32
    # w2_ref: (H, Dp)   bf16, VMEM-resident across the grid
    # b2_ref: (1, Dp)   f32
    # o_ref:  (TB, Dp)  f32, lane-dense (Dp multiple of 128)
    h = jnp.dot(x_ref[...], w1_ref[...], preferred_element_type=jnp.float32)
    h = jnp.maximum(h + b1_ref[...], 0.0)                 # bias + ReLU in f32 on the VPU
    y = jnp.dot(h.astype(w2_ref.dtype), w2_ref[...],      # bf16 hidden into 2nd MXU pass
                preferred_element_type=jnp.float32)
    o_ref[...] = (y + b2_ref[...]).astype(o_ref.dtype)


def prepare_params(w1, b1, w2, b2, *, compute_dtype=jnp.bfloat16):
    """One-time weight prep (keep OUT of the per-call hot path).

    Takes PyTorch-layout params (w1: (H, D), b1: (H,), w2: (D, H), b2: (D,)) and
    returns (in, out)-layout, lane-padded (D -> multiple of 128), compute-dtype tensors.
    Zero rows/cols in the padding keep the math exact for the original D features.
    """
    H, D = w1.shape
    Dp = _round_up(D, 128)
    w1_t = jnp.zeros((Dp, H), compute_dtype).at[:D, :].set(w1.T.astype(compute_dtype))
    w2_t = jnp.zeros((H, Dp), compute_dtype).at[:, :D].set(w2.T.astype(compute_dtype))
    b1_row = b1.reshape(1, H).astype(jnp.float32)
    b2_row = jnp.zeros((1, Dp), jnp.float32).at[:, :D].set(b2.astype(jnp.float32))
    return w1_t, b1_row, w2_t, b2_row


@functools.partial(jax.jit, static_argnames=("block_b",))
def neural_network_forward(x, params, *, block_b=256):
    """x: (B, D). params: output of prepare_params. Returns (B, D) in x.dtype."""
    w1_t, b1_row, w2_t, b2_row = params
    B, D = x.shape
    Dp, H = w1_t.shape
    compute_dtype = w1_t.dtype

    # Batch tiling: largest tile <= block_b that is a multiple of 8 sublanes;
    # pad the batch up to a whole number of tiles (handles any B).
    tb = min(block_b, _round_up(B, 8))
    Bp = _round_up(B, tb)

    x_pad = jnp.pad(x.astype(compute_dtype), ((0, Bp - B), (0, Dp - D)))

    flops = 4 * Bp * Dp * H  # two matmuls, 2*M*K*N each
    bytes_accessed = (x_pad.size * 2 + w1_t.size * 2 + w2_t.size * 2
                      + b1_row.size * 4 + b2_row.size * 4 + Bp * Dp * 4)

    y_pad = pl.pallas_call(
        _mlp_kernel,
        out_shape=jax.ShapeDtypeStruct((Bp, Dp), jnp.float32),
        grid_spec=pltpu.PrefetchScalarGridSpec(
            num_scalar_prefetch=0,
            grid=(Bp // tb,),
            in_specs=[
                pl.BlockSpec((tb, Dp), lambda i: (i, 0)),    # x tile (pipelined)
                pl.BlockSpec((Dp, H), lambda i: (0, 0)),     # W1^T (resident)
                pl.BlockSpec((1, H), lambda i: (0, 0)),      # b1
                pl.BlockSpec((H, Dp), lambda i: (0, 0)),     # W2^T (resident)
                pl.BlockSpec((1, Dp), lambda i: (0, 0)),     # b2
            ],
            out_specs=pl.BlockSpec((tb, Dp), lambda i: (i, 0)),
        ),
        compiler_params=pltpu.CompilerParams(
            # batch tiles are independent -> shard across TensorCores on v7x megacore
            dimension_semantics=("parallel",),
        ),
        cost_estimate=pl.CostEstimate(
            flops=flops, transcendentals=0, bytes_accessed=bytes_accessed),
    )(x_pad, w1_t, b1_row, w2_t, b2_row)

    return y_pad[:B, :D].astype(x.dtype)


def _init_params(key, input_dim, hidden_dim=512, dtype=jnp.float32):
    """Deterministic init matching nn.Linear's default U(-1/sqrt(fan_in), 1/sqrt(fan_in))."""
    k1, k2, k3, k4 = jax.random.split(key, 4)
    bound1 = 1.0 / jnp.sqrt(input_dim)
    bound2 = 1.0 / jnp.sqrt(hidden_dim)
    w1 = jax.random.uniform(k1, (hidden_dim, input_dim), dtype, -bound1, bound1)
    b1 = jax.random.uniform(k2, (hidden_dim,), dtype, -bound1, bound1)
    w2 = jax.random.uniform(k3, (input_dim, hidden_dim), dtype, -bound2, bound2)
    b2 = jax.random.uniform(k4, (input_dim,), dtype, -bound2, bound2)
    return w1, b1, w2, b2


if __name__ == "__main__":
    key = jax.random.PRNGKey(0)
    k_x, k_p = jax.random.split(key)

    batch, input_dim = 8, 32
    x = jax.random.normal(k_x, (batch, input_dim), jnp.float32)
    w1, b1, w2, b2 = _init_params(k_p, input_dim)

    params = prepare_params(w1, b1, w2, b2)        # one-time, outside the hot path
    y = neural_network_forward(x, params)
    y = jax.block_until_ready(y)
    assert y.shape == (batch, input_dim)

    # Reference with matching bf16 rounding of x / weights / hidden (f32 accumulate).
    _bf = lambda a: a.astype(jnp.bfloat16).astype(jnp.float32)
    h_ref = jnp.maximum(_bf(x) @ _bf(w1).T + b1, 0.0)
    ref = _bf(h_ref) @ _bf(w2).T + b2
    assert jnp.allclose(y, ref, atol=5e-3, rtol=5e-3), "mismatch vs reference"

    print("KERNEL_OK")
</pallas_src>

<mosaic_0001>
module attributes {stable_mosaic.version = 11 : i64} {
  func.func @_mlp_kernel(%arg0: i32, %arg1: memref<8x128xbf16, #tpu.memory_space<vmem>>, %arg2: memref<128x512xbf16, #tpu.memory_space<vmem>>, %arg3: memref<1x512xf32, #tpu.memory_space<vmem>>, %arg4: memref<512x128xbf16, #tpu.memory_space<vmem>>, %arg5: memref<1x128xf32, #tpu.memory_space<vmem>>, %arg6: memref<8x128xf32, #tpu.memory_space<vmem>>) attributes {dimension_semantics = [#tpu.dimension_semantics<parallel>], iteration_bounds = array<i64: 1>, scalar_prefetch = 0 : i64, scratch_operands = 0 : i64, tpu.core_type = #tpu.core_type<tc>, window_params = [{transform_indices = @transform_0, window_bounds = array<i64: 8, 128>}, {pipeline_mode = #tpu.pipeline_mode<synchronous>, transform_indices = @transform_1, window_bounds = array<i64: 128, 512>}, {pipeline_mode = #tpu.pipeline_mode<synchronous>, transform_indices = @transform_2, window_bounds = array<i64: 1, 512>}, {pipeline_mode = #tpu.pipeline_mode<synchronous>, transform_indices = @transform_3, window_bounds = array<i64: 512, 128>}, {pipeline_mode = #tpu.pipeline_mode<synchronous>, transform_indices = @transform_4, window_bounds = array<i64: 1, 128>}, {transform_indices = @transform_5, window_bounds = array<i64: 8, 128>}]} {
    %c0 = arith.constant 0 : index
    %c0_0 = arith.constant 0 : index
    %0 = vector.load %arg1[%c0, %c0_0] : memref<8x128xbf16, #tpu.memory_space<vmem>>, vector<8x128xbf16>
    %c0_1 = arith.constant 0 : index
    %c0_2 = arith.constant 0 : index
    %1 = vector.load %arg2[%c0_1, %c0_2] : memref<128x512xbf16, #tpu.memory_space<vmem>>, vector<128x512xbf16>
    %cst = arith.constant dense<0.000000e+00> : vector<8x512xf32>
    %2 = tpu.matmul %0, %1, %cst {dimension_numbers = #tpu.dot_dimension_numbers<[1], [0], [0], [1], [0, 0, 1, 1], [], []>} : vector<8x128xbf16>, vector<128x512xbf16>, vector<8x512xf32> -> vector<8x512xf32>
    %c0_3 = arith.constant 0 : index
    %c0_4 = arith.constant 0 : index
    %3 = vector.load %arg3[%c0_3, %c0_4] : memref<1x512xf32, #tpu.memory_space<vmem>>, vector<1x512xf32>
    %4 = vector.broadcast %3 : vector<1x512xf32> to vector<8x512xf32>
    %5 = arith.addf %2, %4 : vector<8x512xf32>
    %cst_5 = arith.constant 0.000000e+00 : f32
    %6 = vector.broadcast %cst_5 : f32 to vector<8x512xf32>
    %7 = arith.maximumf %5, %6 : vector<8x512xf32>
    %8 = arith.truncf %7 : vector<8x512xf32> to vector<8x512xbf16>
    %c0_6 = arith.constant 0 : index
    %c0_7 = arith.constant 0 : index
    %9 = vector.load %arg4[%c0_6, %c0_7] : memref<512x128xbf16, #tpu.memory_space<vmem>>, vector<512x128xbf16>
    %cst_8 = arith.constant dense<0.000000e+00> : vector<8x128xf32>
    %10 = tpu.matmul %8, %9, %cst_8 {dimension_numbers = #tpu.dot_dimension_numbers<[1], [0], [0], [1], [0, 0, 1, 1], [], []>} : vector<8x512xbf16>, vector<512x128xbf16>, vector<8x128xf32> -> vector<8x128xf32>
    %c0_9 = arith.constant 0 : index
    %c0_10 = arith.constant 0 : index
    %11 = vector.load %arg5[%c0_9, %c0_10] : memref<1x128xf32, #tpu.memory_space<vmem>>, vector<1x128xf32>
    %12 = vector.broadcast %11 : vector<1x128xf32> to vector<8x128xf32>
    %13 = arith.addf %10, %12 : vector<8x128xf32>
    %c0_11 = arith.constant 0 : index
    %c0_12 = arith.constant 0 : index
    %14 = vector.load %arg6[%c0_11, %c0_12] : memref<8x128xf32, #tpu.memory_space<vmem>>, vector<8x128xf32>
    tpu.vector_store %arg6[%c0_11, %c0_12], %13 {strides = array<i32>} : memref<8x128xf32, #tpu.memory_space<vmem>>, vector<8x128xf32>,
    return
  }
  func.func @transform_0(%arg0: i32) -> (i32, i32) {
    %c0_i32 = arith.constant 0 : i32
    %c0_i32_0 = arith.constant 0 : i32
    return %arg0, %c0_i32 : i32, i32
  }
  func.func @transform_1(%arg0: i32) -> (i32, i32) {
    %c0_i32 = arith.constant 0 : i32
    %c0_i32_0 = arith.constant 0 : i32
    %c0_i32_1 = arith.constant 0 : i32
    return %c0_i32, %c0_i32_0 : i32, i32
  }
  func.func @transform_2(%arg0: i32) -> (i32, i32) {
    %c0_i32 = arith.constant 0 : i32
    %c0_i32_0 = arith.constant 0 : i32
    %c0_i32_1 = arith.constant 0 : i32
    return %c0_i32, %c0_i32_0 : i32, i32
  }
  func.func @transform_3(%arg0: i32) -> (i32, i32) {
    %c0_i32 = arith.constant 0 : i32
    %c0_i32_0 = arith.constant 0 : i32
    %c0_i32_1 = arith.constant 0 : i32
    return %c0_i32, %c0_i32_0 : i32, i32
  }
  func.func @transform_4(%arg0: i32) -> (i32, i32) {
    %c0_i32 = arith.constant 0 : i32
    %c0_i32_0 = arith.constant 0 : i32
    %c0_i32_1 = arith.constant 0 : i32
    return %c0_i32, %c0_i32_0 : i32, i32
  }
  func.func @transform_5(%arg0: i32) -> (i32, i32) {
    %c0_i32 = arith.constant 0 : i32
    %c0_i32_0 = arith.constant 0 : i32
    return %arg0, %c0_i32 : i32, i32
  }
}

</mosaic_0001>

<bundles_post_ra>
// kernel: neural_network_forward.1
= control target key start
LH: loop header
LB: loop body
LE: loop exit
PB: predicated region body
PF: predicated region fallthrough
CT: control target
= control target key end

     0   :  { %10 = vsyncpa [#allocation3], 0  ;;  %s1067_s0 = inlined_call_operand.vmem [shape: bf16[8,128], index: 0, kind: input, shape index: {}]   ;;  %s1068_s1 = inlined_call_operand.hbm [shape: bf16[128,512], index: 1, kind: input, shape index: {}]   ;;  %s1069_s2 = inlined_call_operand.vmem [shape: f32[1,512], index: 2, kind: input, shape index: {}]   ;;  %s1070_s3 = inlined_call_operand.hbm [shape: bf16[512,128], index: 3, kind: input, shape index: {}]   ;;  %s1071_s4 = inlined_call_operand.vmem [shape: f32[1,128], index: 4, kind: input, shape index: {}]   ;;  %s1072_s5 = inlined_call_operand.hbm [shape: f32[8,128], index: 5, kind: output, shape index: {}]  }
   0x1   :  { %11 = vsyncpa [#allocation6], 0 }
   0x2   :  { %12 = vsyncpa [#allocation4], 0  ;;  %s984_s18 = smov [#allocation2]   ;;  %s912_s22 = scalar_lea.hbm %s1068_s1, 4096 }
   0x3   :  { %s20_s19 = sshll.u32 %s984_s18, 4  ;;  %p913_p0 = scmp.ne.s32.totalorder %s1068_s1, %s912_s22  ;;  %s21_s19 = int_to_ptr.vmem [resolvable:$true] %s20_s19 }
   0x4   :  { %p916_p1 = scmp.lt.u32.totalorder %s912_s22, %s1068_s1 }
   0x6   :  { %p918_p2 = pnand %p916_p1, %p913_p0 }
   0x8   :  { %921 = shalt.err (!%p918_p2)
}
   0x9   :  { %s922_s27 = scalar_lea.vmem %s21_s19, 4096  ;;  %p927_p4 = scmp.lt.s32.totalorder %s21_s19, %s21_s19 }
   0xa   :  { %p923_p3 = scmp.ne.s32.totalorder %s21_s19, %s922_s27  ;;  %p928_p5 = scmp.lt.s32.totalorder %s922_s27, %s922_s27 }
   0xc   :  { %p929_p6 = por %p928_p5, %p927_p4 }
   0xe   :  { %p930_p7 = pnand %p929_p6, %p923_p3 }
  0x10   :  { %933 = shalt.err (!%p930_p7)
}
  0x11   :  { %s985_s28 = smov 256   ;;  %s986_s29 = smov 16  }
  0x12   :  { %26 = dma.hbm_to_vmem [thread:$0]  %s1068_s1, 4096, %s21_s19, [#allocation3], %s985_s28, %s985_s28, %s986_s29  }
  0x13   :  { %s987_s7 = smov [#allocation5]   ;;  %s934_s11 = scalar_lea.hbm %s1070_s3, 4096 }
  0x14   :  { %s34_s8 = sshll.u32 %s987_s7, 4  ;;  %p935_p8 = scmp.ne.s32.totalorder %s1070_s3, %s934_s11  ;;  %s35_s8 = int_to_ptr.vmem [resolvable:$true] %s34_s8 }
  0x15   :  { %p938_p9 = scmp.lt.u32.totalorder %s934_s11, %s1070_s3 }
  0x17   :  { %p940_p10 = pnand %p938_p9, %p935_p8 }
  0x19   :  { %943 = shalt.err (!%p940_p10)
}
  0x1a   :  { %s944_s16 = scalar_lea.vmem %s35_s8, 4096  ;;  %p949_p12 = scmp.lt.s32.totalorder %s35_s8, %s35_s8 }
  0x1b   :  { %p945_p11 = scmp.ne.s32.totalorder %s35_s8, %s944_s16  ;;  %p950_p13 = scmp.lt.s32.totalorder %s944_s16, %s944_s16 }
  0x1d   :  { %p951_p0 = por %p950_p13, %p949_p12 }
  0x1f   :  { %p952_p1 = pnand %p951_p0, %p945_p11 }
  0x21   :  { %955 = shalt.err (!%p952_p1)
}
  0x22   :  { %s988_s1 = smov 64   ;;  %s989_s17 = smov 4  }
  0x23   :  { %40 = dma.hbm_to_vmem [thread:$0]  %s1070_s3, 4096, %s35_s8, [#allocation6], %s988_s1, %s988_s1, %s989_s17  }
  0x24   :  { %978 = dma.done.wait [#allocation3], 4096  }
  0x25   :  { %979 = vsyncadd [#allocation3], 4294963200 }
  0x26   :  { %980 = dma.done.wait [#allocation6], 4096  }
  0x27   :  { %981 = vsyncadd [#allocation6], 4294963200  ;;  %v990_v0 = vmov 0   ;;  %v832_v1 = vld [vmem:[#allocation2 + $0x4] ss:$16 sps:$4 sm:$0xff]   ;;  %v884_v38 = vld [vmem:[#allocation5 + $0x48] sm:$0xff]  }
  0x28   :  { %297 = vmatprep.mubr.bf16.mxu0 %v990_v0  ;;  %338 = vmatprep.mubr.bf16.mxu1 %v990_v0  ;;  %v834_v2 = vld [vmem:[#allocation2 + $0xc] ss:$16 sps:$4 sm:$0xff]   ;;  %v836_v3 = vld [vmem:[#allocation2] ss:$16 sps:$4 sm:$0xff]   ;;  %v837_v4 = vld [vmem:[#allocation2 + $0x8] ss:$16 sps:$4 sm:$0xff]  }
  0x29   :  { %265 = vmatprep.subr.bf16.mxu0 %v832_v1  ;;  %306 = vmatprep.subr.bf16.mxu1 %v834_v2  ;;  %v838_v5 = vld [vmem:[#allocation2 + $0x24] ss:$16 sps:$4 sm:$0xff]   ;;  %v840_v6 = vld [vmem:[#allocation2 + $0x2c] ss:$16 sps:$4 sm:$0xff]   ;;  %v842_v7 = vld [vmem:[#allocation2 + $0x20] ss:$16 sps:$4 sm:$0xff]   ;;  %v85_v2 = vlaneseq }
  0x2a   :  { %266 = vmatpush1.bf16.msra.mxu0 %v836_v3  ;;  %307 = vmatpush1.bf16.msra.mxu1 %v837_v4  ;;  %v843_v8 = vld [vmem:[#allocation2 + $0x28] ss:$16 sps:$4 sm:$0xff]   ;;  %v844_v9 = vld [vmem:[#allocation2 + $0x44] ss:$16 sps:$4 sm:$0xff]   ;;  %v846_v10 = vld [vmem:[#allocation2 + $0x4c] ss:$16 sps:$4 sm:$0xff]  }
  0x2b   :  { %267 = vmatprep.subr.bf16.mxu0 %v838_v5  ;;  %308 = vmatprep.subr.bf16.mxu1 %v840_v6  ;;  %v848_v11 = vld [vmem:[#allocation2 + $0x40] ss:$16 sps:$4 sm:$0xff]   ;;  %v849_v12 = vld [vmem:[#allocation2 + $0x48] ss:$16 sps:$4 sm:$0xff]   ;;  %v850_v13 = vld [vmem:[#allocation2 + $0x64] ss:$16 sps:$4 sm:$0xff]  }
  0x2c   :  { %v852_v14 = vld [vmem:[#allocation2 + $0x6c] ss:$16 sps:$4 sm:$0xff]   ;;  %v854_v15 = vld [vmem:[#allocation2 + $0x60] ss:$16 sps:$4 sm:$0xff]   ;;  %v855_v16 = vld [vmem:[#allocation2 + $0x68] ss:$16 sps:$4 sm:$0xff]  }
  0x2d   :  { %v856_v17 = vld [vmem:[#allocation2 + $0x84] ss:$16 sps:$4 sm:$0xff]   ;;  %v858_v18 = vld [vmem:[#allocation2 + $0x8c] ss:$16 sps:$4 sm:$0xff]   ;;  %v860_v19 = vld [vmem:[#allocation2 + $0x80] ss:$16 sps:$4 sm:$0xff]  }
  0x2e   :  { %268 = vmatpush1.bf16.msra.mxu0 %v842_v7  ;;  %309 = vmatpush1.bf16.msra.mxu1 %v843_v8  ;;  %v861_v20 = vld [vmem:[#allocation2 + $0x88] ss:$16 sps:$4 sm:$0xff]   ;;  %v862_v21 = vld [vmem:[#allocation2 + $0xa4] ss:$16 sps:$4 sm:$0xff]   ;;  %v864_v22 = vld [vmem:[#allocation2 + $0xac] ss:$16 sps:$4 sm:$0xff]  }
  0x2f   :  { %269 = vmatprep.subr.bf16.mxu0 %v844_v9  ;;  %310 = vmatprep.subr.bf16.mxu1 %v846_v10  ;;  %v866_v23 = vld [vmem:[#allocation2 + $0xa0] ss:$16 sps:$4 sm:$0xff]   ;;  %v867_v24 = vld [vmem:[#allocation2 + $0xa8] ss:$16 sps:$4 sm:$0xff]   ;;  %v868_v25 = vld [vmem:[#allocation2 + $0xc4] ss:$16 sps:$4 sm:$0xff]  }
  0x30   :  { %v870_v26 = vld [vmem:[#allocation2 + $0xcc] ss:$16 sps:$4 sm:$0xff]   ;;  %v872_v27 = vld [vmem:[#allocation2 + $0xc0] ss:$16 sps:$4 sm:$0xff]   ;;  %v873_v28 = vld [vmem:[#allocation2 + $0xc8] ss:$16 sps:$4 sm:$0xff]  }
  0x31   :  { %v874_v29 = vld [vmem:[#allocation2 + $0xe4] ss:$16 sps:$4 sm:$0xff]   ;;  %v876_v30 = vld [vmem:[#allocation2 + $0xec] ss:$16 sps:$4 sm:$0xff]   ;;  %v878_v31 = vld [vmem:[#allocation2 + $0xe0] ss:$16 sps:$4 sm:$0xff]  }
  0x32   :  { %270 = vmatpush1.bf16.msra.mxu0 %v848_v11  ;;  %311 = vmatpush1.bf16.msra.mxu1 %v849_v12  ;;  %v879_v32 = vld [vmem:[#allocation2 + $0xe8] ss:$16 sps:$4 sm:$0xff]   ;;  %v880_v33 = vld [vmem:[#allocation5 + $0x40] sm:$0xff]   ;;  %v50_v35 = vld [vmem:[%s1067_s0] sm:$0xf]  ;;  %v86_v3 = vshrl.u32 %v85_v2, 7 }
  0x33   :  { %271 = vmatprep.subr.bf16.mxu0 %v850_v13  ;;  %312 = vmatprep.subr.bf16.mxu1 %v852_v14  ;;  %v881_v34 = vld [vmem:[#allocation5 + $0xc0] sm:$0xff]   ;;  %v885_v39 = vld [vmem:[#allocation5 + $0xc8] sm:$0xff]   ;;  %v888_v42 = vld [vmem:[#allocation5 + $0x50] sm:$0xff]   ;;  %s991_s23 = smov [#allocation7]  }
  0x34   :  { %v882_v36 = vld [vmem:[#allocation5] sm:$0xff]   ;;  %v886_v40 = vld [vmem:[#allocation5 + $0x8] sm:$0xff]   ;;  %v889_v43 = vld [vmem:[#allocation5 + $0xd0] sm:$0xff]   ;;  %v87_v4 = vsub.s32 0, %v86_v3  ;;  %v95_v5 = vsub.s32 2, %v86_v3  ;;  %v91_v7 = vsub.s32 1, %v86_v3 }
  0x35   :  { %v883_v37 = vld [vmem:[#allocation5 + $0x80] sm:$0xff]   ;;  %v887_v41 = vld [vmem:[#allocation5 + $0x88] sm:$0xff]   ;;  %v890_v44 = vld [vmem:[#allocation5 + $0x10] sm:$0xff]   ;;  %v99_v8 = vsub.s32 3, %v86_v3  ;;  %s705_s24 = sshll.u32 %s991_s23, 4  ;;  %s706_s24 = int_to_ptr.vmem [resolvable:$true] %s705_s24 }
  0x36   :  { %272 = vmatpush1.bf16.msra.mxu0 %v854_v15  ;;  %313 = vmatpush1.bf16.msra.mxu1 %v855_v16  ;;  %v891_v45 = vld [vmem:[#allocation5 + $0x90] sm:$0xff]   ;;  %v892_v46 = vld [vmem:[#allocation5 + $0x58] sm:$0xff]   ;;  %v896_v50 = vld [vmem:[#allocation5 + $0x60] sm:$0xff]   ;;  %s956_s25 = scalar_lea.vmem %s706_s24, 128  ;;  %p961_p3 = scmp.lt.s32.totalorder %s706_s24, %s706_s24 }
  0x37   :  { %273 = vmatprep.subr.bf16.mxu0 %v856_v17  ;;  %314 = vmatprep.subr.bf16.mxu1 %v858_v18  ;;  %v893_v47 = vld [vmem:[#allocation5 + $0xd8] sm:$0xff]   ;;  %v897_v51 = vld [vmem:[#allocation5 + $0xe0] sm:$0xff]   ;;  %v900_v54 = vld [vmem:[#allocation5 + $0x68] sm:$0xff]   ;;  %p957_p2 = scmp.ne.s32.totalorder %s706_s24, %s956_s25  ;;  %p962_p4 = scmp.lt.s32.totalorder %s956_s25, %s956_s25 }
  0x38   :  { %v894_v48 = vld [vmem:[#allocation5 + $0x18] sm:$0xff]   ;;  %v898_v52 = vld [vmem:[#allocation5 + $0x20] sm:$0xff]   ;;  %v901_v55 = vld [vmem:[#allocation5 + $0xe8] sm:$0xff]  }
  0x39   :  { %v895_v49 = vld [vmem:[#allocation5 + $0x98] sm:$0xff]   ;;  %v899_v53 = vld [vmem:[#allocation5 + $0xa0] sm:$0xff]   ;;  %v902_v56 = vld [vmem:[#allocation5 + $0x28] sm:$0xff]   ;;  %p963_p5 = por %p962_p4, %p961_p3 }
  0x3a   :  { %274 = vmatpush1.bf16.msra.mxu0 %v860_v19  ;;  %315 = vmatpush1.bf16.msra.mxu1 %v861_v20  ;;  %v903_v57 = vld [vmem:[#allocation5 + $0xa8] sm:$0xff]   ;;  %v904_v58 = vld [vmem:[#allocation5 + $0x70] sm:$0xff]   ;;  %v908_v62 = vld [vmem:[#allocation5 + $0x78] sm:$0xff]  }
  0x3b   :  { %275 = vmatprep.subr.bf16.mxu0 %v862_v21  ;;  %316 = vmatprep.subr.bf16.mxu1 %v864_v22  ;;  %v905_v59 = vld [vmem:[#allocation5 + $0xf0] sm:$0xff]   ;;  %v909_v63 = vld [vmem:[#allocation5 + $0xf8] sm:$0xff]   ;;  %p964_p6 = pnand %p963_p5, %p957_p2 }
  0x3c   :  { %v906_v60 = vld [vmem:[#allocation5 + $0x30] sm:$0xff]   ;;  %v910_v0 = vld [vmem:[#allocation5 + $0x38] sm:$0xff]  }
  0x3d   :  { %v907_v61 = vld [vmem:[#allocation5 + $0xb0] sm:$0xff]   ;;  %v911_v1 = vld [vmem:[#allocation5 + $0xb8] sm:$0xff]  }
  0x3e   :  { %276 = vmatpush1.bf16.msra.mxu0 %v866_v23  ;;  %317 = vmatpush1.bf16.msra.mxu1 %v867_v24  ;;  %v83_v6 = vld [vmem:[%s1069_s2] sm:$0xf] }
  0x3f   :  { %277 = vmatprep.subr.bf16.mxu0 %v868_v25  ;;  %318 = vmatprep.subr.bf16.mxu1 %v870_v26  ;;  %v88_v9 = vrot.slane %v83_v6, %v87_v4  ;;  %v96_v10 = vrot.slane %v83_v6, %v95_v5  ;;  %v92_v11 = vrot.slane %v83_v6, %v91_v7 }
  0x40   :  { %v100_v12 = vrot.slane %v83_v6, %v99_v8 }
  0x42   :  { %278 = vmatpush1.bf16.msra.mxu0 %v872_v27  ;;  %319 = vmatpush1.bf16.msra.mxu1 %v873_v28 }
  0x43   :  { %279 = vmatprep.subr.bf16.mxu0 %v874_v29  ;;  %320 = vmatprep.subr.bf16.mxu1 %v876_v30 }
  0x46   :  { %280 = vmatpush1.bf16.msra.mxu0 %v878_v31  ;;  %321 = vmatpush1.bf16.msra.mxu1 %v879_v32 }
  0x47   :  { %780 = vmatprep.subr.bf16.mxu0 %v880_v33  ;;  %802 = vmatprep.subr.bf16.mxu1 %v881_v34 }
  0x49   :  { %298 = vmatmul.mubr.bf16.vlgmr.msra.gmra.mrb[0].mxu0 %v50_v35  ;;  %339 = vmatmul.mubr.bf16.vlgmr.msra.gmra.mrb[0].mxu1 %v50_v35  ;;  %v747_v35 = vld [vmem:[%s1071_s4] ss:$0 sm:$0xff] }
  0x4a   :  { %781 = vmatpush3.bf16.msra.mxu0 %v882_v36  ;;  %803 = vmatpush3.bf16.msra.mxu1 %v883_v37 }
  0x4b   :  { %782 = vmatprep.subr.bf16.mxu0 %v884_v38  ;;  %804 = vmatprep.subr.bf16.mxu1 %v885_v39 }
  0x4e   :  { %783 = vmatpush3.bf16.msra.mxu0 %v886_v40  ;;  %805 = vmatpush3.bf16.msra.mxu1 %v887_v41 }
  0x4f   :  { %784 = vmatprep.subr.bf16.mxu0 %v888_v42  ;;  %806 = vmatprep.subr.bf16.mxu1 %v889_v43 }
  0x52   :  { %785 = vmatpush3.bf16.msra.mxu0 %v890_v44  ;;  %807 = vmatpush3.bf16.msra.mxu1 %v891_v45 }
  0x53   :  { %786 = vmatprep.subr.bf16.mxu0 %v892_v46  ;;  %808 = vmatprep.subr.bf16.mxu1 %v893_v47 }
  0x56   :  { %787 = vmatpush3.bf16.msra.mxu0 %v894_v48  ;;  %809 = vmatpush3.bf16.msra.mxu1 %v895_v49 }
  0x57   :  { %788 = vmatprep.subr.bf16.mxu0 %v896_v50  ;;  %810 = vmatprep.subr.bf16.mxu1 %v897_v51 }
  0x5a   :  { %789 = vmatpush3.bf16.msra.mxu0 %v898_v52  ;;  %811 = vmatpush3.bf16.msra.mxu1 %v899_v53 }
  0x5b   :  { %790 = vmatprep.subr.bf16.mxu0 %v900_v54  ;;  %812 = vmatprep.subr.bf16.mxu1 %v901_v55 }
  0x5e   :  { %791 = vmatpush3.bf16.msra.mxu0 %v902_v56  ;;  %813 = vmatpush3.bf16.msra.mxu1 %v903_v57 }
  0x5f   :  { %792 = vmatprep.subr.bf16.mxu0 %v904_v58  ;;  %814 = vmatprep.subr.bf16.mxu1 %v905_v59 }
  0x62   :  { %793 = vmatpush3.bf16.msra.mxu0 %v906_v60  ;;  %815 = vmatpush3.bf16.msra.mxu1 %v907_v61 }
  0x63   :  { %794 = vmatprep.subr.bf16.mxu0 %v908_v62  ;;  %816 = vmatprep.subr.bf16.mxu1 %v909_v63 }
  0x66   :  { %795 = vmatpush3.bf16.msra.mxu0 %v910_v0  ;;  %817 = vmatpush3.bf16.msra.mxu1 %v911_v1 }
 0x11c   :  { %v299_v13 = vpop.f32.mrb[0].mxu0  ;;  %v340_v14 = vpop.f32.mrb[0].mxu1 }
 0x11d   :  { %v300_v15 = vadd.f32 %v299_v13, %v88_v9  ;;  %v341_v16 = vadd.f32 %v340_v14, %v96_v10  ;;  %v301_v17 = vpop.f32.mrb[1].mxu0  ;;  %v342_v18 = vpop.f32.mrb[1].mxu1 }
 0x11e   :  { %v302_v19 = vadd.f32 %v301_v17, %v92_v11  ;;  %v343_v20 = vadd.f32 %v342_v18, %v100_v12  ;;  %v303_v21 = vpop.f32.mrb[2].mxu0  ;;  %v344_v22 = vpop.f32.mrb[2].mxu1 }
 0x11f   :  { %v347_v23 = vmax.f32 %v300_v15, 0.0  ;;  %v349_v24 = vmax.f32 %v341_v16, 0.0  ;;  %v304_v25 = vpop.f32.mrb[3].mxu0  ;;  %v345_v26 = vpop.f32.mrb[3].mxu1 }
 0x120   :  { %v348_v27 = vmax.f32 %v302_v19, 0.0  ;;  %v350_v28 = vmax.f32 %v343_v20, 0.0 }
 0x121   :  { %v353_v29 = vpack.c.bf16 %v349_v24, %v349_v24  ;;  %v351_v32 = vpack.c.bf16 %v347_v23, %v347_v23 }
 0x122   :  { %v352_v30 = vpack.c.bf16 %v348_v27, %v348_v27  ;;  %v354_v31 = vpack.c.bf16 %v350_v28, %v350_v28 }
 0x124   :  { %650 = vmatprep.mubr.bf16.mxu0 %v352_v30  ;;  %690 = vmatprep.mubr.bf16.mxu1 %v354_v31 }
 0x125   :  { %651 = vmatmul.mubr.bf16.vlgmr.msra.gmra.mrb[4].mxu0 %v351_v32  ;;  %691 = vmatmul.mubr.bf16.vlgmr.msra.gmra.mrb[4].mxu1 %v353_v29 }
 0x1f8   :  { %v796_v33 = vpop.f32.mrb[4].mxu0  ;;  %v818_v34 = vpop.f32.mrb[4].mxu1 }
 0x1f9   :  { %v797_v36 = vpop.f32.mrb[5].mxu0  ;;  %v819_v37 = vpop.f32.mrb[5].mxu1 }
 0x1fa   :  { %v798_v38 = vadd.f32 %v797_v36, %v796_v33  ;;  %v820_v39 = vadd.f32 %v819_v37, %v818_v34  ;;  %v799_v40 = vpop.f32.mrb[6].mxu0  ;;  %v821_v41 = vpop.f32.mrb[6].mxu1 }
 0x1fb   :  { %v800_v42 = vpop.f32.mrb[7].mxu0  ;;  %v822_v43 = vpop.f32.mrb[7].mxu1 }
 0x1fc   :  { %v653_v44 = vadd.f32 %v798_v38, %v747_v35 }
 0x1fe   :  { %v693_v45 = vadd.f32 %v820_v39, %v653_v44 }
 0x200   :  { %698 = vst [vmem:[#allocation7] sm:$0xff] %v693_v45 }
 0x201   :  { %967 = shalt.err (!%p964_p6)
}
 0x202   :  { %s968_s27 = scalar_lea.hbm %s1072_s5, 128 }
 0x203   :  { %p969_p7 = scmp.ne.s32.totalorder %s1072_s5, %s968_s27  ;;  %p972_p8 = scmp.lt.u32.totalorder %s968_s27, %s1072_s5 }
 0x205   :  { %p974_p9 = pnand %p972_p8, %p969_p7 }
 0x207   :  { %977 = shalt.err (!%p974_p9)
}
 0x208   :  { %708 = dma.vmem_to_hbm [thread:$0]  %s706_s24, 128, %s1072_s5, [#allocation4]  }
 0x209   :  { %982 = dma.done.wait [#allocation4], 128  }
 0x20a   :  { %983 = vsyncadd [#allocation4], 4294967168 }
 0x20b   :  { %712 = vsyncpa [#allocation3], 1 }
 0x20c   :  { %713 = vsyncpa [#allocation6], 1 }
 0x20d   :  { %714 = vsyncpa [#allocation4], 1 }

</bundles_post_ra>
